<compile_context>
chip_gen: v7x
topology: tpu7x:2x2x1
jax: 0.10.0
libtpu: 0.0.40
codegen_flags: <defaults>
</compile_context>

<pallas_src>
import functools

import jax
import jax.numpy as jnp
from jax.experimental import pallas as pl
from jax.experimental.pallas import tpu as pltpu

IGNORE_INDEX = 5555  # ignore_index used by the module's cross_entropy


def _round_up(x, m):
    return (x + m - 1) // m * m


def _cdiv(a, b):
    return -(-a // b)


def _tpu_vmem_capacity_bytes():
    """Best-effort VMEM capacity query; falls back to the 128 MiB class."""
    try:
        return int(pltpu.get_tpu_info().vmem_capacity_bytes)
    except Exception:
        return 128 * 2**20


def _oim_ce_kernel(tgt_ref, w_ref, x_ref, wt_ref,        # inputs
                   logits_ref, nll_ref,                  # outputs
                   m_sc, l_sc, tl_sc,                    # scratch
                   *, scalar, tile_c, c_valid, mask_cols):
    c = pl.program_id(1)
    last = pl.num_programs(1) - 1

    @pl.when(c == 0)
    def _():
        m_sc[...] = jnp.full_like(m_sc, -jnp.inf)
        l_sc[...] = jnp.zeros_like(l_sc)
        tl_sc[...] = jnp.zeros_like(tl_sc)

    # OIM similarity + scaling for this (row tile, class tile).
    # bf16 operands, f32 accumulation on the MXU; canonical (N,F)x(F,TC) shape.
    logits = scalar * jnp.dot(x_ref[...], wt_ref[...],
                              preferred_element_type=jnp.float32)

    # HBM-write-bound output stream: store as bf16 (halves HBM writeback and
    # vst-slot pressure).  The f32 copy stays in-register for the loss math.
    logits_ref[...] = logits.astype(logits_ref.dtype)

    cls_ids = c * tile_c + jax.lax.broadcasted_iota(jnp.int32, (1, tile_c), 1)

    def update(lg):
        # Online logsumexp accumulation across class tiles (f32).
        m_new = jnp.maximum(m_sc[...], lg.max(axis=-1, keepdims=True))
        l_sc[...] = (l_sc[...] * jnp.exp(m_sc[...] - m_new)
                     + jnp.exp(lg - m_new).sum(axis=-1, keepdims=True))
        m_sc[...] = m_new
        # Target-logit gather via select-and-reduce (no materialized one-hot).
        # Ignored targets arrive as -1 and never match any class id.
        tl_sc[...] += jnp.sum(jnp.where(tgt_ref[...] == cls_ids, lg, 0.0),
                              axis=-1, keepdims=True)

    if mask_cols:  # static python bool: C was padded to c_pad
        # Only the LAST class tile contains padded columns; the other kt-1
        # tiles skip the full-tile compare+select entirely.
        @pl.when(c != last)
        def _():
            update(logits)

        @pl.when(c == last)
        def _():
            update(jnp.where(cls_ids < c_valid, logits, -jnp.inf))
    else:
        update(logits)

    @pl.when(c == last)
    def _():
        lse = m_sc[...] + jnp.log(l_sc[...])               # (TN, 1) f32
        nll_ref[...] = (lse - tl_sc[...]) * w_ref[...]     # per-row weighted NLL


def oim_loss_part_forward(inputs, targets, pad_ratios, part_idx,
                          lut, cq, class_weight, header_cq,
                          *, scalar=30.0, tile_n=None, tile_c=None,
                          vmem_budget_bytes=None,
                          logits_dtype=jnp.bfloat16):
    """Functional forward of OIMLoss_Part. Returns (loss, logits, new_header)."""
    n_part = 7
    vis_part = jnp.ceil(n_part * (1.0 - pad_ratios))
    invis = part_idx.astype(jnp.float32) > vis_part
    unlab = targets < 0
    # new_targets = 5555 (ignored) for invisible or unlabeled samples
    # (matches the module's `new_targets[invis] = new_targets[unlab] = 5555`).
    new_targets = jnp.where(invis | unlab, IGNORE_INDEX, targets).astype(jnp.int32)

    num_labeled = lut.shape[0]
    c_total = num_labeled + cq.shape[0]
    n, f = inputs.shape

    # Per-sample CE weight (class-weight gather + ignore mask): cheap O(N) glue
    # done here instead of an MXU gather per class tile inside the kernel.
    valid = new_targets != IGNORE_INDEX
    safe_t = jnp.clip(new_targets, 0, c_total - 1)
    w_i = jnp.where(valid, class_weight[safe_t], 0.0).astype(jnp.float32)
    tgt_kernel = jnp.where(valid, new_targets, -1).astype(jnp.int32)

    # --- generation-aware budgets -------------------------------------------
    vmem_cap = _tpu_vmem_capacity_bytes()
    big_vmem = vmem_cap >= 96 * 2**20          # v5e/v6e: 128 MiB; v7x: 64 MiB
    if vmem_budget_bytes is None:
        vmem_budget_bytes = (64 if big_vmem else 24) * 2**20
    vmem_limit_cap = (96 if big_vmem else 36) * 2**20

    # --- row tiling: balanced 8-aligned chunks (padding < 8 rows per tile) ---
    if tile_n is None:
        cap_tn = 512 if big_vmem else 256
        nt = max(1, _cdiv(n, cap_tn))
        tile_n = _round_up(_cdiv(n, nt), 8)
        # v7x (64 MiB VMEM, 2 TensorCores): keep >= 2 row tiles so the
        # "parallel" row axis can be sharded across both cores.
        if (not big_vmem) and _cdiv(n, tile_n) < 2 and tile_n >= 16:
            tile_n = _round_up(_cdiv(tile_n, 2), 8)
    tile_n = max(8, _round_up(tile_n, 8))
    n_rows = _cdiv(n, tile_n)
    n_pad = n_rows * tile_n

    # --- class tiling: pad to 128, then balanced divisor (padding < 128/tile) -
    def _step_bytes(tc):
        return (2 * f * tc * 2                # W^T tile (bf16), double-buffered
                + 2 * tile_n * tc * 2         # logits out tile (bf16), double-buffered
                + 2 * tile_n * f * 2          # input tile (bf16)
                + 2 * tile_n * 12             # tgt/weight/nll row tiles
                + 3 * tile_n * 4)             # f32 scratch accumulators

    c128 = _round_up(c_total, 128)
    if tile_c is None:
        cap_tc = min(c128, 2048)
        while cap_tc > 128 and _step_bytes(cap_tc) > vmem_budget_bytes:
            cap_tc -= 128
        kt = _cdiv(c128, cap_tc)
        tile_c = _round_up(_cdiv(c_total, kt), 128)
    tile_c = max(128, _round_up(tile_c, 128))
    kt = _cdiv(c_total, tile_c)
    c_pad = kt * tile_c
    mask_cols = c_pad != c_total

    # --- operand layout: bf16 MXU operands, W pre-transposed to (F, C_pad) ---
    x_p = jnp.zeros((n_pad, f), jnp.bfloat16).at[:n].set(inputs.astype(jnp.bfloat16))
    wt = jnp.zeros((f, c_pad), jnp.bfloat16).at[:, :c_total].set(
        jnp.concatenate([lut, cq], axis=0).astype(jnp.bfloat16).T)
    tgt_p = jnp.full((n_pad, 1), -1, jnp.int32).at[:n, 0].set(tgt_kernel)
    w_p = jnp.zeros((n_pad, 1), jnp.float32).at[:n, 0].set(w_i)

    grid = (n_rows, kt)

    kernel = functools.partial(_oim_ce_kernel, scalar=float(scalar),
                               tile_c=tile_c, c_valid=c_total,
                               mask_cols=mask_cols)

    est = _step_bytes(tile_c)
    vmem_limit = int(min(max(2 * est + (4 << 20), 8 << 20), vmem_limit_cap))

    logits_p, nll_p = pl.pallas_call(
        kernel,
        out_shape=(jax.ShapeDtypeStruct((n_pad, c_pad), logits_dtype),
                   jax.ShapeDtypeStruct((n_pad, 1), jnp.float32)),
        grid_spec=pltpu.PrefetchScalarGridSpec(
            num_scalar_prefetch=0,
            grid=grid,
            in_specs=[
                pl.BlockSpec((tile_n, 1), lambda i, c: (i, 0)),       # targets
                pl.BlockSpec((tile_n, 1), lambda i, c: (i, 0)),       # per-row CE weight
                pl.BlockSpec((tile_n, f), lambda i, c: (i, 0)),       # inputs (bf16)
                # NOTE: if an xprof trace shows exposed W-tile DMA, add
                # pipeline_mode=pl.Buffered(3) here (cheap at these tile sizes).
                pl.BlockSpec((f, tile_c), lambda i, c: (0, c)),       # W^T (bf16)
            ],
            out_specs=[
                pl.BlockSpec((tile_n, tile_c), lambda i, c: (i, c)),  # scaled logits (bf16)
                pl.BlockSpec((tile_n, 1), lambda i, c: (i, 0)),       # per-row weighted nll
            ],
            scratch_shapes=[pltpu.VMEM((tile_n, 1), jnp.float32)] * 3,
        ),
        compiler_params=pltpu.CompilerParams(
            dimension_semantics=("parallel", "arbitrary"),
            vmem_limit_bytes=vmem_limit),
    )(tgt_p, w_p, x_p, wt)

    logits = logits_p[:n, :c_total]

    # PyTorch weighted mean over non-ignored samples (padded rows have w=0 and
    # contribute exactly 0).  Guard the all-ignored / all-zero-weight case that
    # PyTorch would NaN on.
    w_sum = jnp.sum(w_p)
    loss = jnp.where(w_sum > 0, jnp.sum(nll_p) / w_sum, 0.0)

    # header_cq bookkeeping: the module counts every new_target >= num_labeled
    # (i.e. every 5555-ignored sample) toward the circular-queue header.
    new_header = (header_cq
                  + jnp.sum(new_targets >= num_labeled).astype(jnp.int32)
                  ) % cq.shape[0]
    # TODO(synk): lut/cq momentum updates + cq writeback happen in OIM.backward
    # (training-time side effect), not in the forward pass, so they are not
    # implemented here.
    return loss, logits, new_header


if __name__ == "__main__":
    # Small, module-consistent shapes.  C = 250 is NOT a multiple of 128 to
    # exercise the class-padding / last-tile-mask path.
    N = 8                 # number of part features in the batch
    NUM_FEATURES = 32
    NUM_LABELED = 60
    CQ_SIZE = 190
    C = NUM_LABELED + CQ_SIZE
    SCALAR = 30.0

    key = jax.random.PRNGKey(0)
    k_in, k_lut, k_cq = jax.random.split(key, 3)

    inputs = jax.random.normal(k_in, (N, NUM_FEATURES), jnp.float32)
    inputs = inputs / jnp.linalg.norm(inputs, axis=1, keepdims=True)

    lut = jax.random.normal(k_lut, (NUM_LABELED, NUM_FEATURES), jnp.float32)
    lut = lut / jnp.linalg.norm(lut, axis=1, keepdims=True)
    cq = jax.random.normal(k_cq, (CQ_SIZE, NUM_FEATURES), jnp.float32)
    cq = cq / jnp.linalg.norm(cq, axis=1, keepdims=True)
    class_weight = jnp.concatenate(
        [jnp.ones((NUM_LABELED,), jnp.float32),
         jnp.zeros((CQ_SIZE,), jnp.float32)])

    targets = jnp.array([3, 10, -1, 25, 59, -1, 7, 40], jnp.int32)
    pad_ratios = jnp.array([0.0, 0.1, 0.2, 0.5, 0.9, 0.0, 0.3, 0.6], jnp.float32)
    part_idx = jnp.array([1, 2, 3, 4, 7, 2, 5, 6], jnp.int32)
    header_cq = 0

    loss, logits, new_header = oim_loss_part_forward(
        inputs, targets, pad_ratios, part_idx,
        lut, cq, class_weight, header_cq, scalar=SCALAR)
    jax.block_until_ready((loss, logits, new_header))

    # --- pure-JAX reference (bf16-matched operands, f32 accumulation) ---
    vis_part_r = jnp.ceil(7 * (1.0 - pad_ratios))
    invis_r = part_idx.astype(jnp.float32) > vis_part_r
    unlab_r = targets < 0
    new_targets_r = jnp.where(invis_r | unlab_r, IGNORE_INDEX, targets)
    W = jnp.concatenate([lut, cq], axis=0)
    logits_ref = SCALAR * jnp.dot(inputs.astype(jnp.bfloat16),
                                  W.astype(jnp.bfloat16).T,
                                  preferred_element_type=jnp.float32)
    lse = jax.scipy.special.logsumexp(logits_ref, axis=1)
    safe_t = jnp.clip(new_targets_r, 0, C - 1)
    tgt_logit = jnp.take_along_axis(logits_ref, safe_t[:, None], axis=1)[:, 0]
    valid_r = (new_targets_r != IGNORE_INDEX).astype(jnp.float32)
    w_ref = class_weight[safe_t] * valid_r
    loss_ref = jnp.sum((lse - tgt_logit) * w_ref) / jnp.sum(w_ref)

    # Logits output is bf16 (HBM-traffic optimization) -> compare with a bf16
    # rounding tolerance; the loss path is f32 in-kernel and stays tight.
    assert jnp.allclose(logits.astype(jnp.float32), logits_ref,
                        rtol=2e-2, atol=0.25), "logits mismatch"
    assert jnp.allclose(loss, loss_ref, rtol=1e-2, atol=1e-2), "loss mismatch"
    assert int(new_header) == int(jnp.sum(new_targets_r >= NUM_LABELED)) % CQ_SIZE
    print("KERNEL_OK")
</pallas_src>

<mosaic_0001>
module attributes {stable_mosaic.version = 11 : i64} {
  func.func @_oim_ce_kernel(%arg0: i32, %arg1: i32, %arg2: memref<8x1xi32, #tpu.memory_space<vmem>>, %arg3: memref<8x1xf32, #tpu.memory_space<vmem>>, %arg4: memref<8x32xbf16, #tpu.memory_space<vmem>>, %arg5: memref<32x256xbf16, #tpu.memory_space<vmem>>, %arg6: memref<8x256xbf16, #tpu.memory_space<vmem>>, %arg7: memref<8x1xf32, #tpu.memory_space<vmem>>, %arg8: memref<8x1xf32, #tpu.memory_space<vmem>>, %arg9: memref<8x1xf32, #tpu.memory_space<vmem>>, %arg10: memref<8x1xf32, #tpu.memory_space<vmem>>) attributes {dimension_semantics = [#tpu.dimension_semantics<parallel>, #tpu.dimension_semantics<arbitrary>], iteration_bounds = array<i64: 1, 1>, scalar_prefetch = 0 : i64, scratch_operands = 3 : i64, tpu.core_type = #tpu.core_type<tc>, window_params = [{transform_indices = @transform_0, window_bounds = array<i64: 8, 1>}, {transform_indices = @transform_1, window_bounds = array<i64: 8, 1>}, {transform_indices = @transform_2, window_bounds = array<i64: 8, 32>}, {transform_indices = @transform_3, window_bounds = array<i64: 32, 256>}, {transform_indices = @transform_4, window_bounds = array<i64: 8, 256>}, {transform_indices = @transform_5, window_bounds = array<i64: 8, 1>}]} {
    %c0_i32 = arith.constant 0 : i32
    %0 = arith.cmpi eq, %arg1, %c0_i32 : i32
    %1 = arith.extui %0 : i1 to i32
    %c0_i32_0 = arith.constant 0 : i32
    %2 = arith.cmpi ne, %1, %c0_i32_0 : i32
    scf.if %2 {
      %cst_13 = arith.constant 0xFF800000 : f32
      %23 = vector.broadcast %cst_13 : f32 to vector<8x1xf32>
      %c0_14 = arith.constant 0 : index
      %c0_15 = arith.constant 0 : index
      %24 = vector.load %arg8[%c0_14, %c0_15] : memref<8x1xf32, #tpu.memory_space<vmem>>, vector<8x1xf32>
      tpu.vector_store %arg8[%c0_14, %c0_15], %23 {strides = array<i32>} : memref<8x1xf32, #tpu.memory_space<vmem>>, vector<8x1xf32>,
      %cst_16 = arith.constant 0.000000e+00 : f32
      %25 = vector.broadcast %cst_16 : f32 to vector<8x1xf32>
      %c0_17 = arith.constant 0 : index
      %c0_18 = arith.constant 0 : index
      %26 = vector.load %arg9[%c0_17, %c0_18] : memref<8x1xf32, #tpu.memory_space<vmem>>, vector<8x1xf32>
      tpu.vector_store %arg9[%c0_17, %c0_18], %25 {strides = array<i32>} : memref<8x1xf32, #tpu.memory_space<vmem>>, vector<8x1xf32>,
      %cst_19 = arith.constant 0.000000e+00 : f32
      %27 = vector.broadcast %cst_19 : f32 to vector<8x1xf32>
      %c0_20 = arith.constant 0 : index
      %c0_21 = arith.constant 0 : index
      %28 = vector.load %arg10[%c0_20, %c0_21] : memref<8x1xf32, #tpu.memory_space<vmem>>, vector<8x1xf32>
      tpu.vector_store %arg10[%c0_20, %c0_21], %27 {strides = array<i32>} : memref<8x1xf32, #tpu.memory_space<vmem>>, vector<8x1xf32>,
    } else {
    }
    %c0 = arith.constant 0 : index
    %c0_1 = arith.constant 0 : index
    %3 = vector.load %arg4[%c0, %c0_1] : memref<8x32xbf16, #tpu.memory_space<vmem>>, vector<8x32xbf16>
    %c0_2 = arith.constant 0 : index
    %c0_3 = arith.constant 0 : index
    %4 = vector.load %arg5[%c0_2, %c0_3] : memref<32x256xbf16, #tpu.memory_space<vmem>>, vector<32x256xbf16>
    %cst = arith.constant dense<0.000000e+00> : vector<8x256xf32>
    %5 = tpu.matmul %3, %4, %cst {dimension_numbers = #tpu.dot_dimension_numbers<[1], [0], [0], [1], [0, 0, 1, 1], [], []>} : vector<8x32xbf16>, vector<32x256xbf16>, vector<8x256xf32> -> vector<8x256xf32>
    %cst_4 = arith.constant 3.000000e+01 : f32
    %6 = vector.broadcast %cst_4 : f32 to vector<8x256xf32>
    %7 = arith.mulf %6, %5 : vector<8x256xf32>
    %8 = arith.truncf %7 : vector<8x256xf32> to vector<8x256xbf16>
    %c0_5 = arith.constant 0 : index
    %c0_6 = arith.constant 0 : index
    %9 = vector.load %arg6[%c0_5, %c0_6] : memref<8x256xbf16, #tpu.memory_space<vmem>>, vector<8x256xbf16>
    tpu.vector_store %arg6[%c0_5, %c0_6], %8 {strides = array<i32>} : memref<8x256xbf16, #tpu.memory_space<vmem>>, vector<8x256xbf16>,
    %c256_i32 = arith.constant 256 : i32
    %10 = arith.muli %arg1, %c256_i32 : i32
    %11 = tpu.iota {dimensions = array<i32: 1>} : vector<1x256xi32>
    %12 = vector.broadcast %10 : i32 to vector<1x256xi32>
    %13 = arith.addi %12, %11 : vector<1x256xi32>
    %c0_i32_7 = arith.constant 0 : i32
    %14 = arith.cmpi ne, %arg1, %c0_i32_7 : i32
    %15 = arith.extui %14 : i1 to i32
    %c0_i32_8 = arith.constant 0 : i32
    %16 = arith.cmpi ne, %15, %c0_i32_8 : i32
    scf.if %16 {
      %c0_13 = arith.constant 0 : index
      %c0_14 = arith.constant 0 : index
      %23 = vector.load %arg8[%c0_13, %c0_14] : memref<8x1xf32, #tpu.memory_space<vmem>>, vector<8x1xf32>
      %cst_15 = arith.constant dense<0xFF800000> : vector<8xf32>
      %24 = vector.multi_reduction <maximumf>, %7, %cst_15 [1] : vector<8x256xf32> to vector<8xf32>
      %25 = vector.shape_cast %24 : vector<8xf32> to vector<8x1xf32>
      %26 = arith.maximumf %23, %25 : vector<8x1xf32>
      %c0_16 = arith.constant 0 : index
      %c0_17 = arith.constant 0 : index
      %27 = vector.load %arg9[%c0_16, %c0_17] : memref<8x1xf32, #tpu.memory_space<vmem>>, vector<8x1xf32>
      %c0_18 = arith.constant 0 : index
      %c0_19 = arith.constant 0 : index
      %28 = vector.load %arg8[%c0_18, %c0_19] : memref<8x1xf32, #tpu.memory_space<vmem>>, vector<8x1xf32>
      %29 = arith.subf %28, %26 : vector<8x1xf32>
      %30 = math.exp %29 : vector<8x1xf32>
      %31 = arith.mulf %27, %30 : vector<8x1xf32>
      %32 = vector.broadcast %26 : vector<8x1xf32> to vector<8x256xf32>
      %33 = arith.subf %7, %32 : vector<8x256xf32>
      %34 = math.exp %33 : vector<8x256xf32>
      %cst_20 = arith.constant dense<0.000000e+00> : vector<8xf32>
      %35 = vector.multi_reduction <add>, %34, %cst_20 [1] : vector<8x256xf32> to vector<8xf32>
      %36 = vector.shape_cast %35 : vector<8xf32> to vector<8x1xf32>
      %37 = arith.addf %31, %36 : vector<8x1xf32>
      %c0_21 = arith.constant 0 : index
      %c0_22 = arith.constant 0 : index
      %38 = vector.load %arg9[%c0_21, %c0_22] : memref<8x1xf32, #tpu.memory_space<vmem>>, vector<8x1xf32>
      tpu.vector_store %arg9[%c0_21, %c0_22], %37 {strides = array<i32>} : memref<8x1xf32, #tpu.memory_space<vmem>>, vector<8x1xf32>,
      %c0_23 = arith.constant 0 : index
      %c0_24 = arith.constant 0 : index
      %39 = vector.load %arg8[%c0_23, %c0_24] : memref<8x1xf32, #tpu.memory_space<vmem>>, vector<8x1xf32>
      tpu.vector_store %arg8[%c0_23, %c0_24], %26 {strides = array<i32>} : memref<8x1xf32, #tpu.memory_space<vmem>>, vector<8x1xf32>,
      %c0_25 = arith.constant 0 : index
      %c0_26 = arith.constant 0 : index
      %40 = vector.load %arg10[%c0_25, %c0_26] : memref<8x1xf32, #tpu.memory_space<vmem>>, vector<8x1xf32>
      %c0_27 = arith.constant 0 : index
      %c0_28 = arith.constant 0 : index
      %41 = vector.load %arg2[%c0_27, %c0_28] : memref<8x1xi32, #tpu.memory_space<vmem>>, vector<8x1xi32>
      %42 = vector.broadcast %41 : vector<8x1xi32> to vector<8x256xi32>
      %43 = vector.broadcast %13 : vector<1x256xi32> to vector<8x256xi32>
      %44 = arith.cmpi eq, %42, %43 : vector<8x256xi32>
      %cst_29 = arith.constant 0.000000e+00 : f32
      %45 = vector.broadcast %cst_29 : f32 to vector<8x256xf32>
      %46 = arith.select %44, %7, %45 : vector<8x256xi1>, vector<8x256xf32>
      %cst_30 = arith.constant dense<0.000000e+00> : vector<8xf32>
      %47 = vector.multi_reduction <add>, %46, %cst_30 [1] : vector<8x256xf32> to vector<8xf32>
      %48 = vector.shape_cast %47 : vector<8xf32> to vector<8x1xf32>
      %49 = arith.addf %40, %48 : vector<8x1xf32>
      %c0_31 = arith.constant 0 : index
      %c0_32 = arith.constant 0 : index
      %50 = vector.load %arg10[%c0_31, %c0_32] : memref<8x1xf32, #tpu.memory_space<vmem>>, vector<8x1xf32>
      tpu.vector_store %arg10[%c0_31, %c0_32], %49 {strides = array<i32>} : memref<8x1xf32, #tpu.memory_space<vmem>>, vector<8x1xf32>,
    } else {
    }
    %c0_i32_9 = arith.constant 0 : i32
    %17 = arith.cmpi eq, %arg1, %c0_i32_9 : i32
    %18 = arith.extui %17 : i1 to i32
    %c0_i32_10 = arith.constant 0 : i32
    %19 = arith.cmpi ne, %18, %c0_i32_10 : i32
    scf.if %19 {
      %c250_i32 = arith.constant 250 : i32
      %23 = vector.broadcast %c250_i32 : i32 to vector<1x256xi32>
      %24 = arith.cmpi slt, %13, %23 : vector<1x256xi32>
      %cst_13 = arith.constant 0xFF800000 : f32
      %25 = vector.shape_cast %24 : vector<1x256xi1> to vector<1x256xi1>
      %26 = vector.broadcast %25 : vector<1x256xi1> to vector<8x256xi1>
      %27 = vector.broadcast %cst_13 : f32 to vector<8x256xf32>
      %28 = arith.select %26, %7, %27 : vector<8x256xi1>, vector<8x256xf32>
      %c0_14 = arith.constant 0 : index
      %c0_15 = arith.constant 0 : index
      %29 = vector.load %arg8[%c0_14, %c0_15] : memref<8x1xf32, #tpu.memory_space<vmem>>, vector<8x1xf32>
      %cst_16 = arith.constant dense<0xFF800000> : vector<8xf32>
      %30 = vector.multi_reduction <maximumf>, %28, %cst_16 [1] : vector<8x256xf32> to vector<8xf32>
      %31 = vector.shape_cast %30 : vector<8xf32> to vector<8x1xf32>
      %32 = arith.maximumf %29, %31 : vector<8x1xf32>
      %c0_17 = arith.constant 0 : index
      %c0_18 = arith.constant 0 : index
      %33 = vector.load %arg9[%c0_17, %c0_18] : memref<8x1xf32, #tpu.memory_space<vmem>>, vector<8x1xf32>
      %c0_19 = arith.constant 0 : index
      %c0_20 = arith.constant 0 : index
      %34 = vector.load %arg8[%c0_19, %c0_20] : memref<8x1xf32, #tpu.memory_space<vmem>>, vector<8x1xf32>
      %35 = arith.subf %34, %32 : vector<8x1xf32>
      %36 = math.exp %35 : vector<8x1xf32>
      %37 = arith.mulf %33, %36 : vector<8x1xf32>
      %38 = vector.broadcast %32 : vector<8x1xf32> to vector<8x256xf32>
      %39 = arith.subf %28, %38 : vector<8x256xf32>
      %40 = math.exp %39 : vector<8x256xf32>
      %cst_21 = arith.constant dense<0.000000e+00> : vector<8xf32>
      %41 = vector.multi_reduction <add>, %40, %cst_21 [1] : vector<8x256xf32> to vector<8xf32>
      %42 = vector.shape_cast %41 : vector<8xf32> to vector<8x1xf32>
      %43 = arith.addf %37, %42 : vector<8x1xf32>
      %c0_22 = arith.constant 0 : index
      %c0_23 = arith.constant 0 : index
      %44 = vector.load %arg9[%c0_22, %c0_23] : memref<8x1xf32, #tpu.memory_space<vmem>>, vector<8x1xf32>
      tpu.vector_store %arg9[%c0_22, %c0_23], %43 {strides = array<i32>} : memref<8x1xf32, #tpu.memory_space<vmem>>, vector<8x1xf32>,
      %c0_24 = arith.constant 0 : index
      %c0_25 = arith.constant 0 : index
      %45 = vector.load %arg8[%c0_24, %c0_25] : memref<8x1xf32, #tpu.memory_space<vmem>>, vector<8x1xf32>
      tpu.vector_store %arg8[%c0_24, %c0_25], %32 {strides = array<i32>} : memref<8x1xf32, #tpu.memory_space<vmem>>, vector<8x1xf32>,
      %c0_26 = arith.constant 0 : index
      %c0_27 = arith.constant 0 : index
      %46 = vector.load %arg10[%c0_26, %c0_27] : memref<8x1xf32, #tpu.memory_space<vmem>>, vector<8x1xf32>
      %c0_28 = arith.constant 0 : index
      %c0_29 = arith.constant 0 : index
      %47 = vector.load %arg2[%c0_28, %c0_29] : memref<8x1xi32, #tpu.memory_space<vmem>>, vector<8x1xi32>
      %48 = vector.broadcast %47 : vector<8x1xi32> to vector<8x256xi32>
      %49 = vector.broadcast %13 : vector<1x256xi32> to vector<8x256xi32>
      %50 = arith.cmpi eq, %48, %49 : vector<8x256xi32>
      %cst_30 = arith.constant 0.000000e+00 : f32
      %51 = vector.broadcast %cst_30 : f32 to vector<8x256xf32>
      %52 = arith.select %50, %28, %51 : vector<8x256xi1>, vector<8x256xf32>
      %cst_31 = arith.constant dense<0.000000e+00> : vector<8xf32>
      %53 = vector.multi_reduction <add>, %52, %cst_31 [1] : vector<8x256xf32> to vector<8xf32>
      %54 = vector.shape_cast %53 : vector<8xf32> to vector<8x1xf32>
      %55 = arith.addf %46, %54 : vector<8x1xf32>
      %c0_32 = arith.constant 0 : index
      %c0_33 = arith.constant 0 : index
      %56 = vector.load %arg10[%c0_32, %c0_33] : memref<8x1xf32, #tpu.memory_space<vmem>>, vector<8x1xf32>
      tpu.vector_store %arg10[%c0_32, %c0_33], %55 {strides = array<i32>} : memref<8x1xf32, #tpu.memory_space<vmem>>, vector<8x1xf32>,
    } else {
    }
    %c0_i32_11 = arith.constant 0 : i32
    %20 = arith.cmpi eq, %arg1, %c0_i32_11 : i32
    %21 = arith.extui %20 : i1 to i32
    %c0_i32_12 = arith.constant 0 : i32
    %22 = arith.cmpi ne, %21, %c0_i32_12 : i32
    scf.if %22 {
      %c0_13 = arith.constant 0 : index
      %c0_14 = arith.constant 0 : index
      %23 = vector.load %arg8[%c0_13, %c0_14] : memref<8x1xf32, #tpu.memory_space<vmem>>, vector<8x1xf32>
      %c0_15 = arith.constant 0 : index
      %c0_16 = arith.constant 0 : index
      %24 = vector.load %arg9[%c0_15, %c0_16] : memref<8x1xf32, #tpu.memory_space<vmem>>, vector<8x1xf32>
      %25 = math.log %24 : vector<8x1xf32>
      %26 = arith.addf %23, %25 : vector<8x1xf32>
      %c0_17 = arith.constant 0 : index
      %c0_18 = arith.constant 0 : index
      %27 = vector.load %arg10[%c0_17, %c0_18] : memref<8x1xf32, #tpu.memory_space<vmem>>, vector<8x1xf32>
      %28 = arith.subf %26, %27 : vector<8x1xf32>
      %c0_19 = arith.constant 0 : index
      %c0_20 = arith.constant 0 : index
      %29 = vector.load %arg3[%c0_19, %c0_20] : memref<8x1xf32, #tpu.memory_space<vmem>>, vector<8x1xf32>
      %30 = arith.mulf %28, %29 : vector<8x1xf32>
      %c0_21 = arith.constant 0 : index
      %c0_22 = arith.constant 0 : index
      %31 = vector.load %arg7[%c0_21, %c0_22] : memref<8x1xf32, #tpu.memory_space<vmem>>, vector<8x1xf32>
      tpu.vector_store %arg7[%c0_21, %c0_22], %30 {strides = array<i32>} : memref<8x1xf32, #tpu.memory_space<vmem>>, vector<8x1xf32>,
    } else {
    }
    return
  }
  func.func @transform_0(%arg0: i32, %arg1: i32) -> (i32, i32) {
    %c0_i32 = arith.constant 0 : i32
    %c0_i32_0 = arith.constant 0 : i32
    return %arg0, %c0_i32 : i32, i32
  }
  func.func @transform_1(%arg0: i32, %arg1: i32) -> (i32, i32) {
    %c0_i32 = arith.constant 0 : i32
    %c0_i32_0 = arith.constant 0 : i32
    return %arg0, %c0_i32 : i32, i32
  }
  func.func @transform_2(%arg0: i32, %arg1: i32) -> (i32, i32) {
    %c0_i32 = arith.constant 0 : i32
    %c0_i32_0 = arith.constant 0 : i32
    return %arg0, %c0_i32 : i32, i32
  }
  func.func @transform_3(%arg0: i32, %arg1: i32) -> (i32, i32) {
    %c0_i32 = arith.constant 0 : i32
    %c0_i32_0 = arith.constant 0 : i32
    return %c0_i32, %arg1 : i32, i32
  }
  func.func @transform_4(%arg0: i32, %arg1: i32) -> (i32, i32) {
    %c0_i32 = arith.constant 0 : i32
    return %arg0, %arg1 : i32, i32
  }
  func.func @transform_5(%arg0: i32, %arg1: i32) -> (i32, i32) {
    %c0_i32 = arith.constant 0 : i32
    %c0_i32_0 = arith.constant 0 : i32
    return %arg0, %c0_i32 : i32, i32
  }
}

</mosaic_0001>

<bundles_post_ra>
// kernel: tpu_custom_call.1
= control target key start
LH: loop header
LB: loop body
LE: loop exit
PB: predicated region body
PF: predicated region fallthrough
CT: control target
= control target key end

     0   :  { %11 = vsyncpa [#allocation6], 0  ;;  %s417_s0 = inlined_call_operand.vmem [shape: s32[8,1], index: 0, kind: input, shape index: {}]   ;;  %s418_s1 = inlined_call_operand.vmem [shape: f32[8,1], index: 1, kind: input, shape index: {}]   ;;  %s419_s2 = inlined_call_operand.vmem [shape: bf16[8,32], index: 2, kind: input, shape index: {}]   ;;  %s420_s3 = inlined_call_operand.hbm [shape: bf16[32,256], index: 3, kind: input, shape index: {}]   ;;  %s421_s4 = inlined_call_operand.hbm [shape: bf16[8,256], index: 4, kind: output, shape index: {0}]   ;;  %s422_s5 = inlined_call_operand.vmem [shape: f32[8,1], index: 5, kind: output, shape index: {1}]  }
   0x1   :  { %12 = vsyncpa [#allocation7], 0  ;;  %s337_s18 = smov [#allocation5]   ;;  %s289_s22 = scalar_lea.hbm %s420_s3, 512 }
   0x2   :  { %s24_s19 = sshll.u32 %s337_s18, 4  ;;  %p290_p0 = scmp.ne.s32.totalorder %s420_s3, %s289_s22  ;;  %s25_s19 = int_to_ptr.vmem [resolvable:$true] %s24_s19 }
   0x3   :  { %p293_p1 = scmp.lt.u32.totalorder %s289_s22, %s420_s3 }
   0x5   :  { %p295_p2 = pnand %p293_p1, %p290_p0 }
   0x7   :  { %298 = shalt.err (!%p295_p2)
}
   0x8   :  { %s299_s27 = scalar_lea.vmem %s25_s19, 512  ;;  %p304_p4 = scmp.lt.s32.totalorder %s25_s19, %s25_s19 }
   0x9   :  { %p300_p3 = scmp.ne.s32.totalorder %s25_s19, %s299_s27  ;;  %p305_p5 = scmp.lt.s32.totalorder %s299_s27, %s299_s27 }
   0xb   :  { %p306_p6 = por %p305_p5, %p304_p4 }
   0xd   :  { %p307_p7 = pnand %p306_p6, %p300_p3 }
   0xf   :  { %310 = shalt.err (!%p307_p7)
}
  0x10   :  { %s338_s28 = smov 128   ;;  %s339_s29 = smov 8  }
  0x11   :  { %30 = dma.hbm_to_vmem [thread:$0]  %s420_s3, 512, %s25_s19, [#allocation6], %s338_s28, %s338_s28, %s339_s29  }
  0x12   :  { %333 = dma.done.wait [#allocation6], 512  }
  0x13   :  { %334 = vsyncadd [#allocation6], 4294966784  ;;  %v340_v0 = vmov 0   ;;  %v275_v1 = vld [vmem:[#allocation5 + $0x4] ss:$8 sps:$4 sm:$0xff]   ;;  %vm68_vm0 = vcmask 261120   ;;  %v125_v8 = vlaneseq }
  0x14   :  { %104 = vmatprep.mubr.bf16.mxu0 %v340_v0  ;;  %274 = vset.pattern.permute.xlu1 %v340_v0  ;;  %v277_v2 = vld [vmem:[#allocation5] ss:$8 sps:$4 sm:$0xff]   ;;  %v278_v3 = vld [vmem:[#allocation5 + $0x14] ss:$8 sps:$4 sm:$0xff]   ;;  %v280_v4 = vld [vmem:[#allocation5 + $0x10] ss:$8 sps:$4 sm:$0xff]  }
  0x15   :  { %273 = vset.pattern.permute.xlu0 %v340_v0  ;;  %72 = vmatprep.subr.bf16.mxu0 %v275_v1  ;;  %v217_v5 = vld [vmem:[%s417_s0] sm:$0xff]  ;;  %vm39_vm1 = vcmask 7168   ;;  %v341_v7 = vmov -inf   ;;  %v126_v9 = vand.u32 127, %v125_v8  ;;  %v342_v24 = vmov 0.0   ;;  %s343_s0 = smov [#allocation8]  }
  0x16   :  { %73 = vmatpush1.bf16.msra.mxu0 %v277_v2  ;;  %219 = vperm.xlu1 %274, %v217_v5   ;;  %v43_v6 = vld [vmem:[%s419_s2] sm:$0xf]  ;;  %40 = vst.msk [vmem:[#allocation2] sm:$0xff] %vm39_vm1, %v341_v7  ;;  %41 = vst.msk [vmem:[#allocation3] sm:$0xff] %vm39_vm1, %v342_v24  ;;  %s246_s2 = sshll.u32 %s343_s0, 4  ;;  %s247_s2 = int_to_ptr.vmem [resolvable:$true] %s246_s2 }
  0x17   :  { %74 = vmatprep.subr.bf16.mxu0 %v278_v3  ;;  %v127_v10 = vadd.s32 128, %v126_v9  ;;  %42 = vst.msk [vmem:[#allocation4] sm:$0xff] %vm39_vm1, %v342_v24  ;;  %s311_s10 = scalar_lea.vmem %s247_s2, 128  ;;  %p316_p9 = scmp.lt.s32.totalorder %s247_s2, %s247_s2 }
  0x18   :  { %p312_p8 = scmp.ne.s32.totalorder %s247_s2, %s311_s10  ;;  %p317_p10 = scmp.lt.s32.totalorder %s311_s10, %s311_s10 }
  0x19   :  { %vm181_vm2 = vcmp.lt.s32.totalorder %v127_v10, 250 }
  0x1a   :  { %75 = vmatpush1.bf16.msra.mxu0 %v280_v4  ;;  %p318_p11 = por %p317_p10, %p316_p9 }
  0x1c   :  { %p319_p12 = pnand %p318_p11, %p312_p8 }
  0x1d   :  { %263 = vmatmul.mubr.msk.bf16.vlgmr.msra.gmra.mrb[0].mxu0 %vm68_vm0, %v43_v6  ;;  %v188_v25 = vld [vmem:[#allocation2] sm:$0xff] }
  0x95   :  { %v220_v11 = vpop.permute.xlu1 %219 }
  0x96   :  { %vm221_vm3 = vcmp.eq.s32.totalorder %v220_v11, %v126_v9  ;;  %vm222_vm4 = vcmp.eq.s32.totalorder %v220_v11, %v127_v10 }
  0xf0   :  { %v106_v12 = vpop.f32.mrb[0].mxu0 }
  0xf1   :  { %v113_v13 = vmul.f32 30.0, %v106_v12  ;;  %v108_v14 = vpop.f32.mrb[1].mxu0 }
  0xf2   :  { %v114_v15 = vmul.f32 30.0, %v108_v14  ;;  %v110_v16 = vpop.f32.mrb[2].mxu0 }
  0xf3   :  { %v111_v17 = vpop.f32.mrb[3].mxu0  ;;  %v223_v21 = vsel %vm221_vm3, %v113_v13, 0.0 }
  0xf4   :  { %v265_v18 = vpack.c.bf16 %v114_v15, %v113_v13  ;;  %v187_v19 = vsel %vm181_vm2, %v114_v15, -inf }
  0xf5   :  { %v189_v20 = vmax.f32 %v113_v13, %v187_v19  ;;  %v224_v22 = vsel %vm222_vm4, %v187_v19, 0.0 }
  0xf6   :  { %123 = vst [vmem:[#allocation8] sm:$0xff] %v265_v18  ;;  %v225_v23 = vadd.f32 %v224_v22, %v223_v21 }
  0xf7   :  { %190 = vmax.xlane.f32.xlu0 %v189_v20 }
 0x184   :  { %v191_v26 = vpop.xlane.xlu0 %190 }
 0x185   :  { %v192_v27 = vmax.f32 %v188_v25, %v191_v26 }
 0x187   :  { %v194_v28 = vsub.f32 %v188_v25, %v192_v27  ;;  %215 = vst.msk [vmem:[#allocation2] sm:$0xff] %vm39_vm1, %v192_v27  ;;  %200 = vperm.xlu0 %273, %v192_v27  }
 0x206   :  { %v201_v29 = vpop.permute.xlu0 %200 }
 0x207   :  { %v203_v30 = vsub.f32 %v113_v13, %v201_v29  ;;  %v204_v31 = vsub.f32 %v187_v19, %v201_v29 }
 0x209   :  { %v205_v32 = vmul.f32 1.442695, %v203_v30  ;;  %v207_v33 = vmul.f32 1.442695, %v204_v31 }
 0x20b   :  { %281 = vpow2.f32 %v205_v32 }
 0x20c   :  { %283 = vpow2.f32 %v207_v33 }
 0x215   :  { %v282_v34 = vpop.eup %281 }
 0x216   :  { %v284_v35 = vpop.eup %283 }
 0x217   :  { %v209_v36 = vadd.f32 %v284_v35, %v282_v34 }
 0x219   :  { %210 = vadd.xlane.f32.xlu1 %v209_v36 }
 0x21d   :  { %226 = vadd.xlane.f32.xlu1 %v225_v23 }
 0x21e   :  { %322 = shalt.err (!%p319_p12)
}
 0x21f   :  { %s323_s13 = scalar_lea.hbm %s421_s4, 128 }
 0x220   :  { %p324_p13 = scmp.ne.s32.totalorder %s421_s4, %s323_s13  ;;  %p327_p0 = scmp.lt.u32.totalorder %s323_s13, %s421_s4 }
 0x222   :  { %p329_p1 = pnand %p327_p0, %p324_p13 }
 0x224   :  { %332 = shalt.err (!%p329_p1)
}
 0x225   :  { %249 = dma.vmem_to_hbm [thread:$0]  %s247_s2, 128, %s421_s4, [#allocation7]   ;;  %v195_v37 = vmul.f32 1.442695, %v194_v28  ;;  %v193_v39 = vld [vmem:[#allocation3] sm:$0xff]  ;;  %v216_v43 = vld [vmem:[#allocation4] sm:$0xff] }
 0x226   :  { %v230_v49 = vld [vmem:[#allocation2] sm:$0xff] }
 0x227   :  { %285 = vpow2.f32 %v195_v37  ;;  %v237_v51 = vld [vmem:[%s418_s1] sm:$0xff] }
 0x231   :  { %v286_v38 = vpop.eup %285 }
 0x232   :  { %v197_v40 = vmul.f32 %v286_v38, %v193_v39 }
 0x2a6   :  { %v211_v41 = vpop.xlane.xlu1 %210 }
 0x2a7   :  { %v212_v42 = vadd.f32 %v211_v41, %v197_v40 }
 0x2a9   :  { %214 = vst.msk [vmem:[#allocation3] sm:$0xff] %vm39_vm1, %v212_v42 }
 0x2aa   :  { %v227_v44 = vpop.xlane.xlu1 %226 }
 0x2ab   :  { %v228_v45 = vadd.f32 %v227_v44, %v216_v43 }
 0x2ad   :  { %229 = vst.msk [vmem:[#allocation4] sm:$0xff] %vm39_vm1, %v228_v45 }
 0x2b0   :  { %v231_v46 = vld [vmem:[#allocation3] sm:$0xff] }
 0x2b1   :  { %287 = vlog2.f32 %v231_v46 }
 0x2b4   :  { %v235_v52 = vld [vmem:[#allocation4] sm:$0xff] }
 0x2bb   :  { %v288_v47 = vpop.eup %287 }
 0x2bc   :  { %v233_v48 = vmul.f32 0.6931472, %v288_v47 }
 0x2be   :  { %v234_v50 = vadd.f32 %v233_v48, %v230_v49 }
 0x2c0   :  { %v236_v53 = vsub.f32 %v234_v50, %v235_v52 }
 0x2c2   :  { %v238_v54 = vmul.f32 %v237_v51, %v236_v53 }
 0x2c4   :  { %239 = vst.msk [vmem:[%s422_s5] sm:$0xff] %vm39_vm1, %v238_v54 }
 0x2c5   :  { %335 = dma.done.wait [#allocation7], 128  }
 0x2c6   :  { %336 = vsyncadd [#allocation7], 4294967168 }
 0x2c7   :  { %257 = vsyncpa [#allocation6], 1 }
 0x2c8   :  { %258 = vsyncpa [#allocation7], 1 }

</bundles_post_ra>
